<compile_context>
chip_gen: v7x
topology: tpu7x:2x2x1
jax: 0.10.0
libtpu: 0.0.40
codegen_flags: <defaults>
</compile_context>

<pallas_src>
import functools

import jax
import jax.numpy as jnp
from jax.experimental import pallas as pl
from jax.experimental.pallas import tpu as pltpu

EPS = 1e-6
_MIB = 1024 * 1024


@functools.lru_cache(maxsize=1)
def _vmem_capacity_bytes():
    """Physical VMEM per TensorCore; v7x-safe fallback if the query fails."""
    try:
        cap = int(getattr(pltpu.get_tpu_info(), "vmem_capacity_bytes", 0))
        if cap > 0:
            return cap
    except Exception:
        pass
    return 64 * _MIB


def _rowwise_norm_kernel(scale_ref, x_ref, o_ref):
    """One logical row per kernel row (D >= 128, or D that does not pack)."""
    x = x_ref[...].astype(jnp.float32)            # (tile, D)
    d = x.shape[-1]
    # Single pass over the tile: sum and sum-of-squares together.
    s = jnp.sum(x, axis=-1, keepdims=True)
    ss = jnp.sum(x * x, axis=-1, keepdims=True)
    mean = s * jnp.float32(1.0 / d)
    var = (ss - s * mean) * jnp.float32(1.0 / (d - 1))   # unbiased (torch.std)
    var = jnp.maximum(var, 0.0)                   # guard fp cancellation
    f = jax.lax.rsqrt(var) * scale_ref[0]         # rsqrt on the EUP slot
    o_ref[...] = ((x - mean) * f).astype(o_ref.dtype)


def _packed_norm_kernel(scale_ref, red_ref, bcast_ref, x_ref, o_ref, *, d):
    """k = 128 // d logical rows packed per 128-lane kernel row (lane-dense)."""
    x = x_ref[...].astype(jnp.float32)            # (tile, k*d)
    red = red_ref[...]                            # (k*d, k) one-hot segment-reduce
    bc = bcast_ref[...]                           # (k, k*d) one-hot segment-broadcast
    # Segmented sums on the otherwise-idle MXU.
    s = jnp.dot(x, red, preferred_element_type=jnp.float32)       # (tile, k)
    ss = jnp.dot(x * x, red, preferred_element_type=jnp.float32)  # (tile, k)
    mean = s * jnp.float32(1.0 / d)
    var = (ss - s * mean) * jnp.float32(1.0 / (d - 1))
    var = jnp.maximum(var, 0.0)
    f = jax.lax.rsqrt(var) * scale_ref[0]
    # Broadcast per-segment stats back to the 128-lane layout via the MXU.
    mean_b = jnp.dot(mean, bc, preferred_element_type=jnp.float32)  # (tile, k*d)
    f_b = jnp.dot(f, bc, preferred_element_type=jnp.float32)
    o_ref[...] = ((x - mean_b) * f_b).astype(o_ref.dtype)


def _pick_row_tile(rows, lane_width, itemsize, vmem_cap):
    """Byte-targeted row tile: ~4 MiB blocks, VMEM-safe, >= 4 grid steps."""
    pack = max(8, 32 // itemsize)                 # sublane packing multiple per dtype
    row_bytes = lane_width * itemsize
    # Resident bytes per row: in + out double-buffered, + ~2x f32 intermediates.
    per_row = 4 * row_bytes + 2 * lane_width * 4
    budget = max(8 * _MIB, min(int(vmem_cap * 0.75), vmem_cap - 24 * _MIB))
    cap_rows = max(pack, budget // per_row)
    target_rows = max(pack, (4 * _MIB) // row_bytes)
    tile = min(target_rows, cap_rows)
    # Keep >= 4 grid steps (2 per TC on v7x megacore) when the problem allows,
    # else >= 2 for DMA/compute overlap.
    if rows >= 4 * pack:
        tile = min(tile, rows // 4)
    elif rows >= 2 * pack:
        tile = min(tile, rows // 2)
    tile = max(pack, (tile // pack) * pack)
    if tile >= rows:
        return rows                               # single full block (full-dim exemption)
    return tile


@jax.jit
def encoder_forward(x, mask, alpha, bias):
    """Encoder.forward: (empty) layer stack, then the custom LayerNormalization."""
    del mask  # no encoder layers in the stack -> mask never consumed
    B, S, D = x.shape
    assert D > 1, "unbiased std needs D > 1"
    rows = B * S
    itemsize = jnp.dtype(x.dtype).itemsize
    vmem_cap = _vmem_capacity_bytes()

    # Fused per-element scale: alpha * bias / eps (spec: alpha*(x-m)/(std*eps)*bias).
    scale = (alpha.astype(jnp.float32) * bias.astype(jnp.float32) / EPS).reshape(1)

    # Lane-dense packing when D < 128: fold k rows into one 128-lane kernel row
    # (free contiguous reshape).  Fall back to per-row layout otherwise.
    k = 1
    if D < 128 and 128 % D == 0 and rows % (128 // D) == 0:
        k = 128 // D
    # TODO(synk): D < 128 that does not divide 128 (or rows % k != 0) still takes
    #             the masked-store path; pad D to 128 at the model boundary.
    lane_width = k * D
    n_rows = rows // k
    x2d = x.reshape(n_rows, lane_width)           # contiguous -> copy-free

    tile = _pick_row_tile(n_rows, lane_width, itemsize, vmem_cap)
    grid_steps = pl.cdiv(n_rows, tile)            # ragged last block masked by Pallas

    block_bytes = tile * lane_width * itemsize
    needed = 4 * block_bytes + 3 * tile * lane_width * 4
    hard_cap = min(vmem_cap - 16 * _MIB, int(vmem_cap * 0.78))  # ~48 MiB v7x, ~100 MiB v5e/v6e
    vmem_limit = int(max(16 * _MIB, min(hard_cap, 2 * needed)))

    x_spec = pl.BlockSpec((tile, lane_width), lambda i: (i, 0))
    out_spec = pl.BlockSpec((tile, lane_width), lambda i: (i, 0))
    scale_spec = pl.BlockSpec(memory_space=pltpu.MemorySpace.SMEM)

    if k == 1:
        kernel = _rowwise_norm_kernel
        in_specs = [scale_spec, x_spec]
        args = (scale, x2d)
    else:
        lanes = jnp.arange(lane_width, dtype=jnp.int32) // D
        segs = jnp.arange(k, dtype=jnp.int32)
        red = (lanes[:, None] == segs[None, :]).astype(jnp.float32)    # (k*D, k)
        bcast = (segs[:, None] == lanes[None, :]).astype(jnp.float32)  # (k, k*D)
        kernel = functools.partial(_packed_norm_kernel, d=D)
        in_specs = [
            scale_spec,
            pl.BlockSpec((lane_width, k), lambda i: (0, 0)),  # constant block, fetched once
            pl.BlockSpec((k, lane_width), lambda i: (0, 0)),
            x_spec,
        ]
        args = (scale, red, bcast, x2d)

    out2d = pl.pallas_call(
        kernel,
        out_shape=jax.ShapeDtypeStruct((n_rows, lane_width), x.dtype),
        grid_spec=pltpu.PrefetchScalarGridSpec(
            num_scalar_prefetch=0,
            grid=(grid_steps,),
            in_specs=in_specs,
            out_specs=out_spec,
        ),
        compiler_params=pltpu.CompilerParams(
            dimension_semantics=("parallel",),    # megacore sharding on v7x
            vmem_limit_bytes=vmem_limit,
        ),
        cost_estimate=pl.CostEstimate(
            flops=int(8 * rows * D + 4 * rows * lane_width * k),
            transcendentals=int(rows),
            bytes_accessed=int(2 * rows * D * itemsize),
        ),
    )(*args)

    return out2d.reshape(B, S, D)


def _reference(x, alpha, bias):
    """Pure-JAX transcription of the PyTorch module (unbiased std)."""
    d = x.shape[-1]
    mean = jnp.mean(x, axis=-1, keepdims=True)
    std = jnp.sqrt(jnp.sum((x - mean) ** 2, axis=-1, keepdims=True) / (d - 1))
    return alpha[0] * (x - mean) / (std * EPS) * bias[0]


if __name__ == "__main__":
    key = jax.random.PRNGKey(0)
    B, S, D = 2, 8, 32
    x = jax.random.normal(key, (B, S, D), dtype=jnp.float32)
    mask = jnp.ones((B, 1, 1, S), dtype=jnp.float32)  # unused (empty layer stack)

    # Init matching nn.Parameter(torch.ones(1)) / nn.Parameter(torch.zeros(1)).
    alpha = jnp.ones((1,), dtype=jnp.float32)
    bias = jnp.zeros((1,), dtype=jnp.float32)

    out = encoder_forward(x, mask, alpha, bias)
    jax.block_until_ready(out)
    ref = _reference(x, alpha, bias)
    assert out.shape == ref.shape
    assert jnp.allclose(out, ref, atol=1e-4, rtol=1e-4), "default-param check failed"

    # Non-default parameters exercise the nontrivial math path (default bias=0
    # makes the spec formula identically zero).
    alpha2 = jnp.full((1,), 1.3, dtype=jnp.float32)
    bias2 = jnp.full((1,), 0.5, dtype=jnp.float32)
    out2 = encoder_forward(x, mask, alpha2, bias2)
    jax.block_until_ready(out2)
    ref2 = _reference(x, alpha2, bias2)
    assert jnp.allclose(out2, ref2, atol=1e-3, rtol=1e-3), "packed-path check failed"

    # D >= 128 path (row-wise kernel, multiple grid steps).
    x3 = jax.random.normal(jax.random.PRNGKey(1), (2, 16, 256), dtype=jnp.float32)
    mask3 = jnp.ones((2, 1, 1, 16), dtype=jnp.float32)
    out3 = encoder_forward(x3, mask3, alpha2, bias2)
    jax.block_until_ready(out3)
    ref3 = _reference(x3, alpha2, bias2)
    assert jnp.allclose(out3, ref3, atol=1e-3, rtol=1e-3), "rowwise-path check failed"

    # Ragged last block (rows not a multiple of the tile) -> Pallas masking path.
    x4 = jax.random.normal(jax.random.PRNGKey(2), (2, 18, 256), dtype=jnp.float32)
    mask4 = jnp.ones((2, 1, 1, 18), dtype=jnp.float32)
    out4 = encoder_forward(x4, mask4, alpha2, bias2)
    jax.block_until_ready(out4)
    ref4 = _reference(x4, alpha2, bias2)
    assert jnp.allclose(out4, ref4, atol=1e-3, rtol=1e-3), "ragged-block check failed"

    print("KERNEL_OK")
</pallas_src>

<mosaic_0001>
module attributes {stable_mosaic.version = 11 : i64} {
  func.func @_packed_norm_kernel(%arg0: i32, %arg1: memref<1xf32, #tpu.memory_space<smem>>, %arg2: memref<128x4xf32, #tpu.memory_space<vmem>>, %arg3: memref<4x128xf32, #tpu.memory_space<vmem>>, %arg4: memref<4x128xf32, #tpu.memory_space<vmem>>, %arg5: memref<4x128xf32, #tpu.memory_space<vmem>>) attributes {dimension_semantics = [#tpu.dimension_semantics<parallel>], iteration_bounds = array<i64: 1>, scalar_prefetch = 0 : i64, scratch_operands = 0 : i64, tpu.core_type = #tpu.core_type<tc>, window_params = [{transform_indices = @transform_0, window_bounds = array<i64: 1>}, {pipeline_mode = #tpu.pipeline_mode<synchronous>, transform_indices = @transform_1, window_bounds = array<i64: 128, 4>}, {pipeline_mode = #tpu.pipeline_mode<synchronous>, transform_indices = @transform_2, window_bounds = array<i64: 4, 128>}, {transform_indices = @transform_3, window_bounds = array<i64: 4, 128>}, {transform_indices = @transform_4, window_bounds = array<i64: 4, 128>}]} {
    %c0 = arith.constant 0 : index
    %c0_0 = arith.constant 0 : index
    %0 = vector.load %arg4[%c0, %c0_0] : memref<4x128xf32, #tpu.memory_space<vmem>>, vector<4x128xf32>
    %c0_1 = arith.constant 0 : index
    %c0_2 = arith.constant 0 : index
    %1 = vector.load %arg2[%c0_1, %c0_2] : memref<128x4xf32, #tpu.memory_space<vmem>>, vector<128x4xf32>
    %c0_3 = arith.constant 0 : index
    %c0_4 = arith.constant 0 : index
    %2 = vector.load %arg3[%c0_3, %c0_4] : memref<4x128xf32, #tpu.memory_space<vmem>>, vector<4x128xf32>
    %cst = arith.constant dense<0.000000e+00> : vector<4x4xf32>
    %3 = tpu.matmul %0, %1, %cst {dimension_numbers = #tpu.dot_dimension_numbers<[1], [0], [0], [1], [0, 0, 1, 1], [], []>} : vector<4x128xf32>, vector<128x4xf32>, vector<4x4xf32> -> vector<4x4xf32>
    %4 = arith.mulf %0, %0 : vector<4x128xf32>
    %cst_5 = arith.constant dense<0.000000e+00> : vector<4x4xf32>
    %5 = tpu.matmul %4, %1, %cst_5 {dimension_numbers = #tpu.dot_dimension_numbers<[1], [0], [0], [1], [0, 0, 1, 1], [], []>} : vector<4x128xf32>, vector<128x4xf32>, vector<4x4xf32> -> vector<4x4xf32>
    %cst_6 = arith.constant 3.125000e-02 : f32
    %6 = vector.broadcast %cst_6 : f32 to vector<4x4xf32>
    %7 = arith.mulf %3, %6 : vector<4x4xf32>
    %8 = arith.mulf %3, %7 : vector<4x4xf32>
    %9 = arith.subf %5, %8 : vector<4x4xf32>
    %cst_7 = arith.constant 0.0322580636 : f32
    %10 = vector.broadcast %cst_7 : f32 to vector<4x4xf32>
    %11 = arith.mulf %9, %10 : vector<4x4xf32>
    %cst_8 = arith.constant 0.000000e+00 : f32
    %12 = vector.broadcast %cst_8 : f32 to vector<4x4xf32>
    %13 = arith.maximumf %11, %12 : vector<4x4xf32>
    %14 = math.rsqrt %13 : vector<4x4xf32>
    %c0_9 = arith.constant 0 : index
    %15 = memref.load %arg1[%c0_9] : memref<1xf32, #tpu.memory_space<smem>>
    %16 = vector.broadcast %15 : f32 to vector<4x4xf32>
    %17 = arith.mulf %14, %16 : vector<4x4xf32>
    %cst_10 = arith.constant dense<0.000000e+00> : vector<4x128xf32>
    %18 = tpu.matmul %7, %2, %cst_10 {dimension_numbers = #tpu.dot_dimension_numbers<[1], [0], [0], [1], [0, 0, 1, 1], [], []>} : vector<4x4xf32>, vector<4x128xf32>, vector<4x128xf32> -> vector<4x128xf32>
    %cst_11 = arith.constant dense<0.000000e+00> : vector<4x128xf32>
    %19 = tpu.matmul %17, %2, %cst_11 {dimension_numbers = #tpu.dot_dimension_numbers<[1], [0], [0], [1], [0, 0, 1, 1], [], []>} : vector<4x4xf32>, vector<4x128xf32>, vector<4x128xf32> -> vector<4x128xf32>
    %20 = arith.subf %0, %18 : vector<4x128xf32>
    %21 = arith.mulf %20, %19 : vector<4x128xf32>
    %c0_12 = arith.constant 0 : index
    %c0_13 = arith.constant 0 : index
    %22 = vector.load %arg5[%c0_12, %c0_13] : memref<4x128xf32, #tpu.memory_space<vmem>>, vector<4x128xf32>
    tpu.vector_store %arg5[%c0_12, %c0_13], %21 {strides = array<i32>} : memref<4x128xf32, #tpu.memory_space<vmem>>, vector<4x128xf32>,
    return
  }
  func.func @transform_0(%arg0: i32) -> i32 {
    %c0_i32 = arith.constant 0 : i32
    %c0_i32_0 = arith.constant 0 : i32
    return %c0_i32 : i32
  }
  func.func @transform_1(%arg0: i32) -> (i32, i32) {
    %c0_i32 = arith.constant 0 : i32
    %c0_i32_0 = arith.constant 0 : i32
    %c0_i32_1 = arith.constant 0 : i32
    return %c0_i32, %c0_i32_0 : i32, i32
  }
  func.func @transform_2(%arg0: i32) -> (i32, i32) {
    %c0_i32 = arith.constant 0 : i32
    %c0_i32_0 = arith.constant 0 : i32
    %c0_i32_1 = arith.constant 0 : i32
    return %c0_i32, %c0_i32_0 : i32, i32
  }
  func.func @transform_3(%arg0: i32) -> (i32, i32) {
    %c0_i32 = arith.constant 0 : i32
    %c0_i32_0 = arith.constant 0 : i32
    return %arg0, %c0_i32 : i32, i32
  }
  func.func @transform_4(%arg0: i32) -> (i32, i32) {
    %c0_i32 = arith.constant 0 : i32
    %c0_i32_0 = arith.constant 0 : i32
    return %arg0, %c0_i32 : i32, i32
  }
}

</mosaic_0001>

<bundles_post_ra>
// kernel: encoder_forward.1
= control target key start
LH: loop header
LB: loop body
LE: loop exit
PB: predicated region body
PF: predicated region fallthrough
CT: control target
= control target key end

     0   :  { %v519_v0 = vmov 0.0|0.0   ;;  %vm520_vm0 = vmmov 0   ;;  %v521_v6 = vmov 0.0   ;;  %vm190_vm1 = vcmask 1043456   ;;  %s611_s1 = inlined_call_operand.vmem [shape: f32[128,4], index: 1, kind: input, shape index: {}]   ;;  %s612_s3 = inlined_call_operand.vmem [shape: f32[4,128], index: 3, kind: input, shape index: {}]   ;;  %s613_s2 = inlined_call_operand.vmem [shape: f32[4,128], index: 2, kind: input, shape index: {}]   ;;  %s614_s0 = inlined_call_operand.<no memory space> [shape: f32[1], index: 0, kind: input, shape index: {}]   ;;  %s615_s4 = inlined_call_operand.vmem [shape: f32[4,128], index: 4, kind: output, shape index: {}]  }
   0x1   :  { %466 = vmatprep.subr.bf16.mxu0 %v519_v0  ;;  %v19_v1 = vld [vmem:[%s611_s1] sm:$0xff]  ;;  %v20_v2 = vld [vmem:[%s611_s1 + $0x8] sm:$0xff]  ;;  %490 = vmatprep.subr.bf16.mxu1 %v519_v0  ;;  %v21_v3 = vld [vmem:[%s611_s1 + $0x10] sm:$0xff]  ;;  %vm186_vm2 = vcmask 31744   ;;  %v184_v38 = vstv %s614_s0 }
   0x2   :  { %v467_v4 = vpack.c.bf16 %v20_v2, %v19_v1  ;;  %v22_v5 = vld [vmem:[%s611_s1 + $0x18] sm:$0xff]  ;;  %418 = vmatprep.mubr.msk.f32.mxu0 %vm520_vm0, %v521_v6  ;;  %453 = vmatprep.mubr.msk.f32.mxu1 %vm520_vm0, %v521_v6  ;;  %v23_v8 = vld [vmem:[%s611_s1 + $0x20] sm:$0xff]  ;;  %v24_v9 = vld [vmem:[%s611_s1 + $0x28] sm:$0xff] }
   0x3   :  { %v470_v7 = vpack.c.bf16 %v22_v5, %v21_v3  ;;  %v473_v10 = vpack.c.bf16 %v24_v9, %v23_v8  ;;  %v25_v11 = vld [vmem:[%s611_s1 + $0x30] sm:$0xff]  ;;  %v26_v12 = vld [vmem:[%s611_s1 + $0x38] sm:$0xff]  ;;  %v27_v14 = vld [vmem:[%s611_s1 + $0x40] sm:$0xff] }
   0x4   :  { %468 = vmatpush3.bf16.msra.mxu0 %v467_v4  ;;  %492 = vmatpush3.bf16.msra.mxu1 %v467_v4  ;;  %v476_v13 = vpack.c.bf16 %v26_v12, %v25_v11  ;;  %v28_v15 = vld [vmem:[%s611_s1 + $0x48] sm:$0xff]  ;;  %v29_v17 = vld [vmem:[%s611_s1 + $0x50] sm:$0xff]  ;;  %v30_v18 = vld [vmem:[%s611_s1 + $0x58] sm:$0xff] }
   0x5   :  { %469 = vmatprep.subr.bf16.mxu0 %v519_v0  ;;  %493 = vmatprep.subr.bf16.mxu1 %v519_v0  ;;  %v479_v16 = vpack.c.bf16 %v28_v15, %v27_v14  ;;  %v482_v19 = vpack.c.bf16 %v30_v18, %v29_v17  ;;  %v31_v20 = vld [vmem:[%s611_s1 + $0x60] sm:$0xff]  ;;  %v32_v21 = vld [vmem:[%s611_s1 + $0x68] sm:$0xff]  ;;  %v33_v23 = vld [vmem:[%s611_s1 + $0x70] sm:$0xff] }
   0x6   :  { %v485_v22 = vpack.c.bf16 %v32_v21, %v31_v20  ;;  %v34_v24 = vld [vmem:[%s611_s1 + $0x78] sm:$0xff]  ;;  %v18_v26 = vld [vmem:[%s612_s3] sm:$0xf] }
   0x7   :  { %v488_v25 = vpack.c.bf16 %v34_v24, %v33_v23  ;;  %v106_v27 = vmul.f32 %v18_v26, %v18_v26  ;;  %v35_v28 = vld [vmem:[%s613_s2] sm:$0xf] }
   0x8   :  { %471 = vmatpush3.bf16.msra.mxu0 %v470_v7  ;;  %495 = vmatpush3.bf16.msra.mxu1 %v470_v7 }
   0x9   :  { %472 = vmatprep.subr.bf16.mxu0 %v519_v0  ;;  %496 = vmatprep.subr.bf16.mxu1 %v519_v0 }
   0xc   :  { %474 = vmatpush3.bf16.msra.mxu0 %v473_v10  ;;  %498 = vmatpush3.bf16.msra.mxu1 %v473_v10 }
   0xd   :  { %475 = vmatprep.subr.bf16.mxu0 %v519_v0  ;;  %499 = vmatprep.subr.bf16.mxu1 %v519_v0 }
  0x10   :  { %477 = vmatpush3.bf16.msra.mxu0 %v476_v13  ;;  %501 = vmatpush3.bf16.msra.mxu1 %v476_v13 }
  0x11   :  { %478 = vmatprep.subr.bf16.mxu0 %v519_v0  ;;  %502 = vmatprep.subr.bf16.mxu1 %v519_v0 }
  0x14   :  { %480 = vmatpush3.bf16.msra.mxu0 %v479_v16  ;;  %504 = vmatpush3.bf16.msra.mxu1 %v479_v16 }
  0x15   :  { %481 = vmatprep.subr.bf16.mxu0 %v519_v0  ;;  %505 = vmatprep.subr.bf16.mxu1 %v519_v0 }
  0x18   :  { %483 = vmatpush3.bf16.msra.mxu0 %v482_v19  ;;  %507 = vmatpush3.bf16.msra.mxu1 %v482_v19 }
  0x19   :  { %484 = vmatprep.subr.bf16.mxu0 %v519_v0  ;;  %508 = vmatprep.subr.bf16.mxu1 %v519_v0 }
  0x1c   :  { %486 = vmatpush3.bf16.msra.mxu0 %v485_v22  ;;  %510 = vmatpush3.bf16.msra.mxu1 %v485_v22 }
  0x1d   :  { %487 = vmatprep.subr.bf16.mxu0 %v519_v0  ;;  %511 = vmatprep.subr.bf16.mxu1 %v519_v0 }
  0x20   :  { %489 = vmatpush3.bf16.msra.mxu0 %v488_v25  ;;  %513 = vmatpush3.bf16.msra.mxu1 %v488_v25 }
  0x21   :  { %456 = vmatprep.subr.mxu0 %v521_v6  ;;  %461 = vmatprep.subr.mxu1 %v521_v6 }
  0x23   :  { %419 = vmatmul.mubr.f32.vlgmr.msra.gmra.mrb[0].mxu0 %v18_v26  ;;  %454 = vmatmul.mubr.f32.vlgmr.msra.gmra.mrb[0].mxu1 %v106_v27 }
  0x24   :  { %458 = vmatprep.mubr.msk.f32.mxu0 %vm520_vm0, %v521_v6  ;;  %463 = vmatprep.mubr.msk.f32.mxu1 %vm520_vm0, %v521_v6 }
  0x25   :  { %457 = vmatpush3.msk.msra.mxu0 %vm190_vm1, %v35_v28  ;;  %462 = vmatpush3.msk.msra.mxu1 %vm190_vm1, %v35_v28 }
  0xf6   :  { %v102_v29 = vpop.f32.mrb[0].mxu0  ;;  %v173_v30 = vpop.f32.mrb[0].mxu1 }
  0xf7   :  { %v177_v31 = vmul.f32 0.03125, %v102_v29  ;;  %v420_v32 = vpop.f32.mrb[1].mxu0  ;;  %v455_v33 = vpop.f32.mrb[1].mxu1 }
  0xf9   :  { %v178_v34 = vmul.f32 %v177_v31, %v102_v29  ;;  %459 = vmatmul.mubr.msk.f32.vlgmr.msra.gmra.mrb[2].mxu0 %vm186_vm2, %v177_v31 }
  0xfb   :  { %v179_v35 = vsub.f32 %v173_v30, %v178_v34 }
  0xfd   :  { %v180_v36 = vmul.f32 0.032258064, %v179_v35 }
  0xff   :  { %v181_v37 = vmax.f32 %v180_v36, 0.0 }
 0x101   :  { %517 = vrsqrt.f32 %v181_v37 }
 0x10b   :  { %v518_v39 = vpop.eup %517 }
 0x10c   :  { %v185_v40 = vmul.f32 %v518_v39, %v184_v38 }
 0x10e   :  { %464 = vmatmul.mubr.msk.f32.vlgmr.msra.gmra.mrb[2].mxu1 %vm186_vm2, %v185_v40 }
 0x1cc   :  { %v260_v41 = vpop.f32.mrb[2].mxu0 }
 0x1cd   :  { %v460_v42 = vpop.f32.mrb[3].mxu0  ;;  %v337_v43 = vsub.f32 %v18_v26, %v260_v41 }
 0x1e1   :  { %v333_v44 = vpop.f32.mrb[2].mxu1 }
 0x1e2   :  { %v338_v45 = vmul.f32 %v337_v43, %v333_v44  ;;  %v465_v46 = vpop.f32.mrb[3].mxu1 }
 0x1e4   :  { %339 = vst [vmem:[%s615_s4] sm:$0xf] %v338_v45 }

</bundles_post_ra>
